<compile_context>
chip_gen: v6e
topology: v6e:2x2x1
jax: 0.10.0
libtpu: 0.0.40
codegen_flags: <defaults>
</compile_context>

<pallas_src>
import functools

import jax
import jax.numpy as jnp
from jax.experimental import pallas as pl
from jax.experimental.pallas import tpu as pltpu

BN_EPS = 1e-5
_VMEM_BUDGET = 40 * 1024 * 1024   # stay well inside v7x's 64 MiB physical VMEM
_VMEM_LIMIT = 48 * 1024 * 1024    # scoped-VMEM limit handed to Mosaic


def _round_up(x, m):
    return ((x + m - 1) // m) * m


def _mlp_kernel(x_ref, w1_ref, b1_ref, w2t_ref, b2t_ref, out_ref):
    """One batch tile: (BN-folded) Linear -> ReLU -> Linear, fused in VMEM.

    Output is written transposed, (out_pad sublanes, TILE_B lanes), so the
    lane-dense axis is the batch -> small, dense stores.
    """
    x = x_ref[...].astype(w1_ref.dtype)                     # cast in VMEM (free)
    h = jnp.dot(x, w1_ref[...],
                preferred_element_type=jnp.float32)         # (tb, H) on MXU, f32 acc
    h = jnp.maximum(h + b1_ref[...], 0.0)                   # bias + ReLU on VPU
    h = h.astype(w2t_ref.dtype)
    # (out_pad, tb) = w2t (out_pad, H) . h (tb, H), contracting over H.
    logits_t = jax.lax.dot_general(
        w2t_ref[...], h,
        dimension_numbers=(((1,), (1,)), ((), ())),
        preferred_element_type=jnp.float32)
    out_ref[...] = (logits_t + b2t_ref[...]).astype(out_ref.dtype)


def fold_params(params, compute_dtype=jnp.bfloat16):
    """Once-per-model host prep (call at load time, NOT per forward).

    * Eval-mode BatchNorm folded into the first Linear.
    * Logits head stored transposed and zero-padded to 8 output sublanes.
    * Weights cast to `compute_dtype`; biases stay f32 (added to f32 acc).
    """
    (w1, b1, gamma, beta, running_mean, running_var, w2, b2) = params
    scale = gamma * jax.lax.rsqrt(running_var + BN_EPS)               # (1, H)
    w1f = (w1 * scale).astype(compute_dtype)                          # (in_dim, H)
    b1f = ((b1 - running_mean) * scale + beta).astype(jnp.float32)    # (1, H)

    hidden, num_classes = w2.shape
    out_pad = _round_up(max(num_classes, 1), 8)
    w2t = jnp.zeros((out_pad, hidden), compute_dtype).at[:num_classes, :].set(
        w2.T.astype(compute_dtype))                                   # (out_pad, H)
    b2t = jnp.zeros((out_pad, 1), jnp.float32).at[:num_classes, :].set(b2.T)
    return (w1f, b1f, w2t, b2t)


def _vmem_bytes(tb, in_dim, hidden, out_pad, w_itemsize, x_itemsize):
    # BlockSpec inputs/outputs are double-buffered by default.
    weights = 2 * ((in_dim * hidden + out_pad * hidden) * w_itemsize
                   + (hidden + out_pad) * 4)
    io = 2 * (tb * in_dim * x_itemsize + out_pad * tb * 4)
    interm = tb * hidden * (4 + w_itemsize)          # h (f32) + its cast copy
    return weights + io + interm


def mlp_classifier_forward(x, folded, *, num_classes, tile_b=2048):
    """x: (B, in_dim). Returns logits (B, num_classes) in float32.

    `folded` is the output of `fold_params`.  Passing x already in bf16 halves
    the input byte stream; f32 is also fine (cast happens in VMEM).
    """
    w1f, b1f, w2t, b2t = folded
    B, in_dim = x.shape
    hidden = w1f.shape[1]
    out_pad = w2t.shape[0]
    w_isz = jnp.dtype(w1f.dtype).itemsize
    x_isz = jnp.dtype(x.dtype).itemsize

    # Batch tile: large (amortizes per-step pipeline overhead), multiple of 128
    # (lane dim of the transposed output), shrunk if it would blow VMEM.
    tb = max(128, (int(tile_b) // 128) * 128)
    while tb > 128 and _vmem_bytes(tb, in_dim, hidden, out_pad, w_isz, x_isz) > _VMEM_BUDGET:
        tb //= 2
    # TODO(synk): if the resident weights alone approach the VMEM budget (very
    # large in_dim/hidden), add a K-axis grid dim with an f32 accumulator
    # instead of keeping w1 whole in VMEM.

    if B <= tb:
        tb = B                      # single full-batch tile; block dims == array dims
        grid = (1,)
    else:
        grid = (pl.cdiv(B, tb),)    # no host pad; Mosaic masks the partial block

    out_t = pl.pallas_call(
        _mlp_kernel,
        out_shape=jax.ShapeDtypeStruct((out_pad, B), jnp.float32),
        grid=grid,
        in_specs=[
            pl.BlockSpec((tb, in_dim), lambda i: (i, 0)),        # x tile (pipelined)
            pl.BlockSpec((in_dim, hidden), lambda i: (0, 0)),    # w1' resident
            pl.BlockSpec((1, hidden), lambda i: (0, 0)),         # b1' resident
            pl.BlockSpec((out_pad, hidden), lambda i: (0, 0)),   # w2^T (padded) resident
            pl.BlockSpec((out_pad, 1), lambda i: (0, 0)),        # b2^T (padded) resident
        ],
        out_specs=pl.BlockSpec((out_pad, tb), lambda i: (0, i)),
        compiler_params=pltpu.CompilerParams(
            dimension_semantics=("parallel",),
            vmem_limit_bytes=_VMEM_LIMIT),
    )(x, w1f, b1f, w2t, b2t)

    # Tiny (out_pad, B) slab -> (B, num_classes); fuses under jit.
    return out_t[:num_classes, :].T


def init_params(key, in_dim, hidden_dim, num_classes):
    """Deterministic init matching the PyTorch module's parameter shapes.

    Linear layers use U(-1/sqrt(fan_in), 1/sqrt(fan_in)) (PyTorch default);
    BatchNorm1d uses its default init (weight=1, bias=0, running stats 0/1).
    Weights are stored transposed: (in_features, out_features).
    """
    k1, k2, k3, k4 = jax.random.split(key, 4)
    bound1 = 1.0 / jnp.sqrt(in_dim)
    w1 = jax.random.uniform(k1, (in_dim, hidden_dim), jnp.float32, -bound1, bound1)
    b1 = jax.random.uniform(k2, (1, hidden_dim), jnp.float32, -bound1, bound1)
    gamma = jnp.ones((1, hidden_dim), jnp.float32)
    beta = jnp.zeros((1, hidden_dim), jnp.float32)
    running_mean = jnp.zeros((1, hidden_dim), jnp.float32)
    running_var = jnp.ones((1, hidden_dim), jnp.float32)
    bound2 = 1.0 / jnp.sqrt(hidden_dim)
    w2 = jax.random.uniform(k3, (hidden_dim, num_classes), jnp.float32, -bound2, bound2)
    b2 = jax.random.uniform(k4, (1, num_classes), jnp.float32, -bound2, bound2)
    return (w1, b1, gamma, beta, running_mean, running_var, w2, b2)


def reference_forward(x, params):
    """Pure-JAX reference (eval-mode semantics) for correctness check."""
    (w1, b1, gamma, beta, mean, var, w2, b2) = params
    h = x @ w1 + b1
    h = (h - mean) * jax.lax.rsqrt(var + BN_EPS) * gamma + beta
    h = jnp.maximum(h, 0.0)
    return h @ w2 + b2


if __name__ == "__main__":
    in_dim = 32
    hidden_dim = in_dim * 2   # hidden_dims=None -> [in_dim * 2]
    num_classes = 2

    key = jax.random.PRNGKey(0)
    kx, kp, kx2 = jax.random.split(key, 3)
    params = init_params(kp, in_dim, hidden_dim, num_classes)

    # --- Test A: tiny batch, f32 compute, single tile, tight tolerance ---
    batch = 8
    x = jax.random.normal(kx, (batch, in_dim), jnp.float32)
    folded_f32 = fold_params(params, compute_dtype=jnp.float32)
    logits = mlp_classifier_forward(x, folded_f32, num_classes=num_classes)
    logits = jax.block_until_ready(logits)
    ref = reference_forward(x, params)
    assert logits.shape == (batch, num_classes)
    assert jnp.allclose(logits, ref, atol=1e-5, rtol=1e-5), "f32 mismatch vs reference"

    # --- Test B: multi-step grid with a partial last block, bf16 compute ---
    batch2 = 300
    x2 = jax.random.normal(kx2, (batch2, in_dim), jnp.float32)
    folded_bf16 = fold_params(params)                     # bf16 weights (default)
    fwd = jax.jit(functools.partial(mlp_classifier_forward,
                                    num_classes=num_classes, tile_b=128))
    logits2 = jax.block_until_ready(fwd(x2, folded_bf16))
    ref2 = reference_forward(x2, params)
    assert logits2.shape == (batch2, num_classes)
    assert jnp.allclose(logits2, ref2, atol=3e-2, rtol=3e-2), "bf16 mismatch vs reference"

    print("KERNEL_OK")
</pallas_src>

<mosaic_0001>
module attributes {stable_mosaic.version = 11 : i64} {
  func.func @_mlp_kernel(%arg0: i32, %arg1: memref<8x32xf32, #tpu.memory_space<vmem>>, %arg2: memref<32x64xf32, #tpu.memory_space<vmem>>, %arg3: memref<1x64xf32, #tpu.memory_space<vmem>>, %arg4: memref<8x64xf32, #tpu.memory_space<vmem>>, %arg5: memref<8x1xf32, #tpu.memory_space<vmem>>, %arg6: memref<8x8xf32, #tpu.memory_space<vmem>>) attributes {dimension_semantics = [#tpu.dimension_semantics<parallel>], iteration_bounds = array<i64: 1>, scalar_prefetch = 0 : i64, scratch_operands = 0 : i64, tpu.core_type = #tpu.core_type<tc>, window_params = [{transform_indices = @transform_0, window_bounds = array<i64: 8, 32>}, {pipeline_mode = #tpu.pipeline_mode<synchronous>, transform_indices = @transform_1, window_bounds = array<i64: 32, 64>}, {pipeline_mode = #tpu.pipeline_mode<synchronous>, transform_indices = @transform_2, window_bounds = array<i64: 1, 64>}, {pipeline_mode = #tpu.pipeline_mode<synchronous>, transform_indices = @transform_3, window_bounds = array<i64: 8, 64>}, {pipeline_mode = #tpu.pipeline_mode<synchronous>, transform_indices = @transform_4, window_bounds = array<i64: 8, 1>}, {transform_indices = @transform_5, window_bounds = array<i64: 8, 8>}]} {
    %c0 = arith.constant 0 : index
    %c0_0 = arith.constant 0 : index
    %0 = vector.load %arg1[%c0, %c0_0] : memref<8x32xf32, #tpu.memory_space<vmem>>, vector<8x32xf32>
    %c0_1 = arith.constant 0 : index
    %c0_2 = arith.constant 0 : index
    %1 = vector.load %arg2[%c0_1, %c0_2] : memref<32x64xf32, #tpu.memory_space<vmem>>, vector<32x64xf32>
    %cst = arith.constant dense<0.000000e+00> : vector<8x64xf32>
    %2 = tpu.matmul %0, %1, %cst {dimension_numbers = #tpu.dot_dimension_numbers<[1], [0], [0], [1], [0, 0, 1, 1], [], []>} : vector<8x32xf32>, vector<32x64xf32>, vector<8x64xf32> -> vector<8x64xf32>
    %c0_3 = arith.constant 0 : index
    %c0_4 = arith.constant 0 : index
    %3 = vector.load %arg3[%c0_3, %c0_4] : memref<1x64xf32, #tpu.memory_space<vmem>>, vector<1x64xf32>
    %4 = vector.broadcast %3 : vector<1x64xf32> to vector<8x64xf32>
    %5 = arith.addf %2, %4 : vector<8x64xf32>
    %cst_5 = arith.constant 0.000000e+00 : f32
    %6 = vector.broadcast %cst_5 : f32 to vector<8x64xf32>
    %7 = arith.maximumf %5, %6 : vector<8x64xf32>
    %c0_6 = arith.constant 0 : index
    %c0_7 = arith.constant 0 : index
    %8 = vector.load %arg4[%c0_6, %c0_7] : memref<8x64xf32, #tpu.memory_space<vmem>>, vector<8x64xf32>
    %cst_8 = arith.constant dense<0.000000e+00> : vector<8x8xf32>
    %9 = tpu.matmul %8, %7, %cst_8 {dimension_numbers = #tpu.dot_dimension_numbers<[1], [1], [0], [0], [0, 0, 1, 0], [], []>} : vector<8x64xf32>, vector<8x64xf32>, vector<8x8xf32> -> vector<8x8xf32>
    %c0_9 = arith.constant 0 : index
    %c0_10 = arith.constant 0 : index
    %10 = vector.load %arg5[%c0_9, %c0_10] : memref<8x1xf32, #tpu.memory_space<vmem>>, vector<8x1xf32>
    %11 = vector.broadcast %10 : vector<8x1xf32> to vector<8x8xf32>
    %12 = arith.addf %9, %11 : vector<8x8xf32>
    %c0_11 = arith.constant 0 : index
    %c0_12 = arith.constant 0 : index
    %13 = vector.load %arg6[%c0_11, %c0_12] : memref<8x8xf32, #tpu.memory_space<vmem>>, vector<8x8xf32>
    tpu.vector_store %arg6[%c0_11, %c0_12], %12 {strides = array<i32>} : memref<8x8xf32, #tpu.memory_space<vmem>>, vector<8x8xf32>,
    return
  }
  func.func @transform_0(%arg0: i32) -> (i32, i32) {
    %c0_i32 = arith.constant 0 : i32
    %c0_i32_0 = arith.constant 0 : i32
    return %arg0, %c0_i32 : i32, i32
  }
  func.func @transform_1(%arg0: i32) -> (i32, i32) {
    %c0_i32 = arith.constant 0 : i32
    %c0_i32_0 = arith.constant 0 : i32
    %c0_i32_1 = arith.constant 0 : i32
    return %c0_i32, %c0_i32_0 : i32, i32
  }
  func.func @transform_2(%arg0: i32) -> (i32, i32) {
    %c0_i32 = arith.constant 0 : i32
    %c0_i32_0 = arith.constant 0 : i32
    %c0_i32_1 = arith.constant 0 : i32
    return %c0_i32, %c0_i32_0 : i32, i32
  }
  func.func @transform_3(%arg0: i32) -> (i32, i32) {
    %c0_i32 = arith.constant 0 : i32
    %c0_i32_0 = arith.constant 0 : i32
    %c0_i32_1 = arith.constant 0 : i32
    return %c0_i32, %c0_i32_0 : i32, i32
  }
  func.func @transform_4(%arg0: i32) -> (i32, i32) {
    %c0_i32 = arith.constant 0 : i32
    %c0_i32_0 = arith.constant 0 : i32
    %c0_i32_1 = arith.constant 0 : i32
    return %c0_i32, %c0_i32_0 : i32, i32
  }
  func.func @transform_5(%arg0: i32) -> (i32, i32) {
    %c0_i32 = arith.constant 0 : i32
    %c0_i32_0 = arith.constant 0 : i32
    return %c0_i32, %arg0 : i32, i32
  }
}

</mosaic_0001>

<bundles_post_ra>
// kernel: tpu_custom_call.1
= control target key start
LH: loop header
LB: loop body
LE: loop exit
PB: predicated region body
PF: predicated region fallthrough
CT: control target
= control target key end

     0   :  { %10 = vsyncpa [#allocation3], 0  ;;  %s394_s0 = inlined_call_operand.vmem [shape: f32[8,32], index: 0, kind: input, shape index: {}]   ;;  %s395_s1 = inlined_call_operand.hbm [shape: f32[32,64], index: 1, kind: input, shape index: {}]   ;;  %s396_s2 = inlined_call_operand.vmem [shape: f32[1,64], index: 2, kind: input, shape index: {}]   ;;  %s397_s3 = inlined_call_operand.hbm [shape: f32[8,64], index: 3, kind: input, shape index: {}]   ;;  %s398_s4 = inlined_call_operand.vmem [shape: f32[8,1], index: 4, kind: input, shape index: {}]   ;;  %s399_s5 = inlined_call_operand.hbm [shape: f32[8,8], index: 5, kind: output, shape index: {}]  }
   0x1   :  { %11 = vsyncpa [#allocation6], 0 }
   0x2   :  { %12 = vsyncpa [#allocation4], 0  ;;  %s338_s18 = smov [#allocation2]  }
   0x3   :  { %s20_s19 = sshll.u32 %s338_s18, 4  ;;  %s21_s19 = int_to_ptr.vmem [resolvable:$true] %s20_s19 }
   0x4   :  { %s280_s20 = scalar_lea.vmem %s21_s19, 512  ;;  %p285_p1 = scmp.lt.s32.totalorder %s21_s19, %s21_s19 }
   0x5   :  { %p281_p0 = scmp.ne.s32.totalorder %s21_s19, %s280_s20  ;;  %p286_p2 = scmp.lt.s32.totalorder %s280_s20, %s280_s20 }
   0x7   :  { %p287_p3 = por %p286_p2, %p285_p1 }
   0x9   :  { %p288_p4 = pnand %p287_p3, %p281_p0 }
   0xb   :  { %291 = shalt.err (!%p288_p4)
}
   0xc   :  { %s339_s21 = smov 128   ;;  %s340_s22 = smov 8  }
   0xd   :  { %26 = dma.hbm_to_vmem [thread:$0]  %s395_s1, 512, %s21_s19, [#allocation3], %s339_s21, %s339_s21, %s340_s22  }
   0xe   :  { %s341_s25 = smov [#allocation5]  }
   0xf   :  { %s35_s26 = sshll.u32 %s341_s25, 4  ;;  %s36_s26 = int_to_ptr.vmem [resolvable:$true] %s35_s26 }
  0x10   :  { %s300_s27 = scalar_lea.vmem %s36_s26, 128  ;;  %p305_p6 = scmp.lt.s32.totalorder %s36_s26, %s36_s26 }
  0x11   :  { %p301_p5 = scmp.ne.s32.totalorder %s36_s26, %s300_s27  ;;  %p306_p7 = scmp.lt.s32.totalorder %s300_s27, %s300_s27 }
  0x13   :  { %p307_p8 = por %p306_p7, %p305_p6 }
  0x15   :  { %p308_p9 = pnand %p307_p8, %p301_p5 }
  0x17   :  { %311 = shalt.err (!%p308_p9)
}
  0x18   :  { %38 = dma.hbm_to_vmem [thread:$0]  %s397_s3, 128, %s36_s26, [#allocation6]  }
  0x19   :  { %332 = dma.done.wait [#allocation3], 512  }
  0x1a   :  { %333 = vsyncadd [#allocation3], 4294966784 }
  0x1b   :  { %334 = dma.done.wait [#allocation6], 128  }
  0x1c   :  { %335 = vsyncadd [#allocation6], 4294967168  ;;  %v342_v0 = vmov 0.0   ;;  %vm343_vm0 = vmmov 0   ;;  %v51_v1 = vld [vmem:[#allocation2 + $0x18] sm:$0xff]  ;;  %v50_v2 = vld [vmem:[#allocation2 + $0x10] sm:$0xff] }
  0x1d   :  { %247 = vmatprep.subr.mxu0 %v342_v0  ;;  %255 = vmatprep.mubr.msk.f32.mxu0 %vm343_vm0, %v342_v0  ;;  %v49_v3 = vld [vmem:[#allocation2 + $0x8] sm:$0xff]  ;;  %v48_v4 = vld [vmem:[#allocation2] sm:$0xff]  ;;  %vm59_vm1 = vcmask 261120   ;;  %v344_v7 = vmov 0   ;;  %vm141_vm2 = vcmask 523264   ;;  %vm218_vm3 = vcmask 64512  }
  0x1e   :  { %258 = vmatprep.subr.mxu1 %v342_v0  ;;  %260 = vmatprep.mubr.msk.f32.mxu1 %vm343_vm0, %v342_v0  ;;  %v47_v5 = vld [vmem:[%s394_s0] sm:$0xff]  ;;  %s345_s0 = smov [#allocation7]  }
  0x1f   :  { %248 = vmatpush3.msra.mxu0 %v51_v1  ;;  %v135_v6 = vld [vmem:[%s398_s4] sm:$0xff]  ;;  %271 = vset.pattern.permute.xlu0 %v344_v7  ;;  %s226_s9 = sshll.u32 %s345_s0, 4  ;;  %s227_s9 = int_to_ptr.vmem [resolvable:$true] %s226_s9 }
  0x20   :  { %249 = vmatprep.subr.mxu0 %v342_v0  ;;  %138 = vperm.xlu0 %271, %v135_v6   ;;  %v236_v8 = vld [vmem:[%s396_s2] ss:$0 sm:$0xff]  ;;  %s312_s4 = scalar_lea.vmem %s227_s9, 128  ;;  %p317_p11 = scmp.lt.s32.totalorder %s227_s9, %s227_s9 }
  0x21   :  { %250 = vmatpush3.msra.mxu0 %v50_v2  ;;  %v134_v13 = vld [vmem:[#allocation5] sm:$0xff]  ;;  %p313_p10 = scmp.ne.s32.totalorder %s227_s9, %s312_s4  ;;  %p318_p12 = scmp.lt.s32.totalorder %s312_s4, %s312_s4 }
  0x22   :  { %251 = vmatprep.subr.mxu0 %v342_v0 }
  0x23   :  { %252 = vmatpush3.msra.mxu0 %v49_v3  ;;  %p319_p13 = por %p318_p12, %p317_p11 }
  0x24   :  { %253 = vmatprep.subr.mxu0 %v342_v0 }
  0x25   :  { %254 = vmatpush3.msra.mxu0 %v48_v4  ;;  %p320_p0 = pnand %p319_p13, %p313_p10 }
  0x26   :  { %256 = vmatmul.mubr.msk.f32.vlgmr.msra.gmra.mxu0 %vm59_vm1, %v47_v5 }
  0x9b   :  { %v139_v14 = vpop.permute.xlu0 %138 }
  0xe6   :  { %v129_v9 = vpop.f32.mrf.mxu0 }
  0xe7   :  { %v130_v10 = vadd.f32 %v236_v8, %v129_v9 }
  0xe8   :  { %v257_v11 = vpop.f32.mrf.mxu0 }
  0xe9   :  { %v133_v12 = vmax.f32 %v130_v10, 0.0 }
  0xeb   :  { %259 = vmatpush3.xpose.msk.msra.mxu1 %vm141_vm2, %v133_v12 }
  0xee   :  { %261 = vmatmul.mubr.msk.f32.vlgmr.msra.gmra.mxu1 %vm141_vm2, %v134_v13 }
 0x1ae   :  { %v214_v15 = vpop.f32.mrf.mxu1 }
 0x1af   :  { %v215_v16 = vadd.f32 %v214_v15, %v139_v14 }
 0x1b0   :  { %v262_v17 = vpop.f32.mrf.mxu1 }
 0x1b1   :  { %219 = vst.msk [vmem:[#allocation7] sm:$0xff] %vm218_vm3, %v215_v16 }
 0x1b2   :  { %323 = shalt.err (!%p320_p0)
}
 0x1b3   :  { %229 = dma.vmem_to_hbm [thread:$0]  %s227_s9, 128, %s399_s5, [#allocation4]  }
 0x1b4   :  { %336 = dma.done.wait [#allocation4], 128  }
 0x1b5   :  { %337 = vsyncadd [#allocation4], 4294967168 }
 0x1b6   :  { %233 = vsyncpa [#allocation3], 1 }
 0x1b7   :  { %234 = vsyncpa [#allocation6], 1 }
 0x1b8   :  { %235 = vsyncpa [#allocation4], 1 }

</bundles_post_ra>
